<compile_context>
chip_gen: v7x
topology: tpu7x:2x2x1
jax: 0.10.0
libtpu: 0.0.40
codegen_flags: <defaults>
</compile_context>

<pallas_src>
import jax
import jax.numpy as jnp
from jax.experimental import pallas as pl
from jax.experimental.pallas import tpu as pltpu

# ---------------- model dimensions (small MLP classifier) -----------------
D = 32   # input_size (flattened image)
H = 64   # hidden units
C = 16   # number of classes


def mlp_softmax_kernel(x_ref, p1_ref, p2_ref, o_ref):
    x = x_ref[...]                                   # (B, D)

    # Carve the packed parameter slabs apart with static row slices.
    w1 = p1_ref[0:D, :]                              # (D, H)
    w2 = p1_ref[D:D + H, :]                          # (H, H)
    b1 = p1_ref[D + H:D + H + 1, :]                  # (1, H)
    b2 = p1_ref[D + H + 1:D + H + 2, :]              # (1, H)
    w3 = p2_ref[0:H, :]                              # (H, C)
    b3 = p2_ref[H:H + 1, :]                          # (1, C)

    # Linear 1 + ReLU
    h1 = jnp.dot(x, w1, preferred_element_type=jnp.float32) + b1
    h1 = jnp.maximum(h1, 0.0)

    # Linear 2 + ReLU
    h2 = jnp.dot(h1, w2, preferred_element_type=jnp.float32) + b2
    h2 = jnp.maximum(h2, 0.0)

    # Linear 3 -> logits over the real C classes (no lane padding).
    logits = jnp.dot(h2, w3, preferred_element_type=jnp.float32) + b3

    # Numerically stable softmax over the class axis (exact divide for parity
    # with torch.nn.Softmax).
    m = jnp.max(logits, axis=-1, keepdims=True)
    e = jnp.exp(logits - m)
    denom = jnp.sum(e, axis=-1, keepdims=True)
    o_ref[...] = (e / denom).astype(o_ref.dtype)


def pack_params(w1, b1, w2, b2, w3, b3):
    """Pack parameters ONCE (outside the forward path) into two slabs so the
    kernel only needs 3 input DMAs (x, p1, p2) instead of 7."""
    p1 = jnp.concatenate([w1, w2, b1, b2], axis=0)   # (D + H + 2, H)
    p2 = jnp.concatenate([w3, b3], axis=0)           # (H + 1, C)
    return p1, p2


@jax.jit
def mlp_forward(x, p1, p2):
    # Mirror X.view(-1, input_size): accept images of any leading shape.
    x = x.reshape(-1, D).astype(jnp.float32)
    B = x.shape[0]

    flops = 2 * B * (D * H + H * H + H * C) + 6 * B * H + 4 * B * C
    bytes_accessed = 4 * (B * D + p1.size + p2.size + B * C)
    transcendentals = B * C  # one exp per logit

    vmem = pl.BlockSpec(memory_space=pltpu.MemorySpace.VMEM)
    return pl.pallas_call(
        mlp_softmax_kernel,
        out_shape=jax.ShapeDtypeStruct((B, C), jnp.float32),
        in_specs=[vmem, vmem, vmem],
        out_specs=vmem,
        cost_estimate=pl.CostEstimate(
            flops=flops,
            bytes_accessed=bytes_accessed,
            transcendentals=transcendentals,
        ),
    )(x, p1, p2)


def init_params(key):
    """Deterministic Kaiming-uniform-ish init matching torch.nn.Linear shapes
    (stored transposed: [in, out])."""
    k1, k2, k3, k4, k5, k6 = jax.random.split(key, 6)

    def lin(kw, kb, fan_in, fan_out):
        bound = 1.0 / jnp.sqrt(fan_in)
        w = jax.random.uniform(kw, (fan_in, fan_out), jnp.float32, -bound, bound)
        b = jax.random.uniform(kb, (1, fan_out), jnp.float32, -bound, bound)
        return w, b

    w1, b1 = lin(k1, k2, D, H)
    w2, b2 = lin(k3, k4, H, H)
    w3, b3 = lin(k5, k6, H, C)
    return w1, b1, w2, b2, w3, b3


def reference_forward(x, w1, b1, w2, b2, w3, b3):
    x = x.reshape(-1, D)
    h1 = jnp.maximum(x @ w1 + b1, 0.0)
    h2 = jnp.maximum(h1 @ w2 + b2, 0.0)
    logits = h2 @ w3 + b3
    return jax.nn.softmax(logits, axis=-1)


if __name__ == "__main__":
    B = 16  # small batch for the demo; the wrapper handles any batch size
    key = jax.random.PRNGKey(0)
    kx, kp = jax.random.split(key)
    x = jax.random.normal(kx, (B, D), jnp.float32)
    params = init_params(kp)

    # Pack once, reuse on every forward call (hoisted out of the hot path).
    p1, p2 = pack_params(*params)
    p1 = jax.block_until_ready(p1)
    p2 = jax.block_until_ready(p2)

    out = mlp_forward(x, p1, p2)
    out = jax.block_until_ready(out)

    ref = reference_forward(x, *params)
    assert out.shape == (B, C)
    assert jnp.allclose(out, ref, atol=1e-5, rtol=1e-5), "mismatch vs JAX reference"
    # rows of the softmax output sum to 1 (exact divide in kernel)
    assert jnp.allclose(jnp.sum(out, axis=-1), jnp.ones((B,)), atol=1e-5)

    print("KERNEL_OK")
</pallas_src>

<mosaic_0001>
module attributes {stable_mosaic.version = 11 : i64} {
  func.func @mlp_softmax_kernel(%arg0: memref<16x32xf32, #tpu.memory_space<vmem>>, %arg1: memref<98x64xf32, #tpu.memory_space<vmem>>, %arg2: memref<65x16xf32, #tpu.memory_space<vmem>>, %arg3: memref<16x16xf32, #tpu.memory_space<vmem>>) attributes {dimension_semantics = [], scalar_prefetch = 0 : i64, scratch_operands = 0 : i64, tpu.core_type = #tpu.core_type<tc>} {
    %c0 = arith.constant 0 : index
    %c0_0 = arith.constant 0 : index
    %0 = vector.load %arg0[%c0, %c0_0] : memref<16x32xf32, #tpu.memory_space<vmem>>, vector<16x32xf32>
    %c0_1 = arith.constant 0 : index
    %c0_2 = arith.constant 0 : index
    %1 = vector.load %arg1[%c0_1, %c0_2] : memref<98x64xf32, #tpu.memory_space<vmem>>, vector<32x64xf32>
    %c32 = arith.constant 32 : index
    %c0_3 = arith.constant 0 : index
    %2 = vector.load %arg1[%c32, %c0_3] : memref<98x64xf32, #tpu.memory_space<vmem>>, vector<64x64xf32>
    %c96 = arith.constant 96 : index
    %c0_4 = arith.constant 0 : index
    %3 = vector.load %arg1[%c96, %c0_4] : memref<98x64xf32, #tpu.memory_space<vmem>>, vector<1x64xf32>
    %c97 = arith.constant 97 : index
    %c0_5 = arith.constant 0 : index
    %4 = vector.load %arg1[%c97, %c0_5] : memref<98x64xf32, #tpu.memory_space<vmem>>, vector<1x64xf32>
    %c0_6 = arith.constant 0 : index
    %c0_7 = arith.constant 0 : index
    %5 = vector.load %arg2[%c0_6, %c0_7] : memref<65x16xf32, #tpu.memory_space<vmem>>, vector<64x16xf32>
    %c64 = arith.constant 64 : index
    %c0_8 = arith.constant 0 : index
    %6 = vector.load %arg2[%c64, %c0_8] : memref<65x16xf32, #tpu.memory_space<vmem>>, vector<1x16xf32>
    %cst = arith.constant dense<0.000000e+00> : vector<16x64xf32>
    %7 = tpu.matmul %0, %1, %cst {dimension_numbers = #tpu.dot_dimension_numbers<[1], [0], [0], [1], [0, 0, 1, 1], [], []>} : vector<16x32xf32>, vector<32x64xf32>, vector<16x64xf32> -> vector<16x64xf32>
    %8 = vector.broadcast %3 : vector<1x64xf32> to vector<16x64xf32>
    %9 = arith.addf %7, %8 : vector<16x64xf32>
    %cst_9 = arith.constant 0.000000e+00 : f32
    %10 = vector.broadcast %cst_9 : f32 to vector<16x64xf32>
    %11 = arith.maximumf %9, %10 : vector<16x64xf32>
    %cst_10 = arith.constant dense<0.000000e+00> : vector<16x64xf32>
    %12 = tpu.matmul %11, %2, %cst_10 {dimension_numbers = #tpu.dot_dimension_numbers<[1], [0], [0], [1], [0, 0, 1, 1], [], []>} : vector<16x64xf32>, vector<64x64xf32>, vector<16x64xf32> -> vector<16x64xf32>
    %13 = vector.broadcast %4 : vector<1x64xf32> to vector<16x64xf32>
    %14 = arith.addf %12, %13 : vector<16x64xf32>
    %cst_11 = arith.constant 0.000000e+00 : f32
    %15 = vector.broadcast %cst_11 : f32 to vector<16x64xf32>
    %16 = arith.maximumf %14, %15 : vector<16x64xf32>
    %cst_12 = arith.constant dense<0.000000e+00> : vector<16x16xf32>
    %17 = tpu.matmul %16, %5, %cst_12 {dimension_numbers = #tpu.dot_dimension_numbers<[1], [0], [0], [1], [0, 0, 1, 1], [], []>} : vector<16x64xf32>, vector<64x16xf32>, vector<16x16xf32> -> vector<16x16xf32>
    %18 = vector.broadcast %6 : vector<1x16xf32> to vector<16x16xf32>
    %19 = arith.addf %17, %18 : vector<16x16xf32>
    %cst_13 = arith.constant dense<0xFF800000> : vector<16xf32>
    %20 = vector.multi_reduction <maximumf>, %19, %cst_13 [1] : vector<16x16xf32> to vector<16xf32>
    %21 = vector.shape_cast %20 : vector<16xf32> to vector<16x1xf32>
    %22 = vector.broadcast %21 : vector<16x1xf32> to vector<16x16xf32>
    %23 = arith.subf %19, %22 : vector<16x16xf32>
    %24 = math.exp %23 : vector<16x16xf32>
    %cst_14 = arith.constant dense<0.000000e+00> : vector<16xf32>
    %25 = vector.multi_reduction <add>, %24, %cst_14 [1] : vector<16x16xf32> to vector<16xf32>
    %26 = vector.shape_cast %25 : vector<16xf32> to vector<16x1xf32>
    %27 = vector.broadcast %26 : vector<16x1xf32> to vector<16x16xf32>
    %28 = arith.divf %24, %27 : vector<16x16xf32>
    %c0_15 = arith.constant 0 : index
    %c0_16 = arith.constant 0 : index
    %29 = vector.load %arg3[%c0_15, %c0_16] : memref<16x16xf32, #tpu.memory_space<vmem>>, vector<16x16xf32>
    tpu.vector_store %arg3[%c0_15, %c0_16], %28 {strides = array<i32>} : memref<16x16xf32, #tpu.memory_space<vmem>>, vector<16x16xf32>,
    return
  }
}

</mosaic_0001>

<bundles_post_ra>
// kernel: mlp_forward.1
= control target key start
LH: loop header
LB: loop body
LE: loop exit
PB: predicated region body
PF: predicated region fallthrough
CT: control target
= control target key end

     0   :  { %vm44_vm0 = vcmask 261120   ;;  %s623_s0 = inlined_call_operand.vmem [shape: f32[16,32], index: 0, kind: input, shape index: {}]   ;;  %s624_s1 = inlined_call_operand.vmem [shape: f32[98,64], index: 1, kind: input, shape index: {}]   ;;  %s625_s2 = inlined_call_operand.vmem [shape: f32[65,16], index: 2, kind: input, shape index: {}]   ;;  %s626_s3 = inlined_call_operand.hbm [shape: f32[16,16], index: 3, kind: output, shape index: {}]  }
   0x1   :  { %v17_v0 = vld [vmem:[%s624_s1] sm:$0xff]  ;;  %v18_v1 = vld [vmem:[%s624_s1 + $0x8] sm:$0xff]  ;;  %v19_v2 = vld [vmem:[%s624_s1 + $0x10] sm:$0xff] }
   0x2   :  { %v426_v3 = vpack.c.bf16 %v18_v1, %v17_v0  ;;  %v20_v4 = vld [vmem:[%s624_s1 + $0x18] sm:$0xff]  ;;  %v15_v5 = vld [vmem:[%s623_s0] sm:$0xff]  ;;  %v22_v8 = vld [vmem:[%s624_s1 + $0x28] sm:$0xff] }
   0x3   :  { %v430_v6 = vpack.c.bf16 %v20_v4, %v19_v2  ;;  %385 = vmatprep.mubr.msk.f32.mxu0 %vm44_vm0, %v15_v5  ;;  %v21_v7 = vld [vmem:[%s624_s1 + $0x20] sm:$0xff]  ;;  %v23_v9 = vld [vmem:[%s624_s1 + $0x30] sm:$0xff]  ;;  %v24_v11 = vld [vmem:[%s624_s1 + $0x38] sm:$0xff] }
   0x4   :  { %427 = vmatprep.subr.bf16.mxu0 %v426_v3  ;;  %v434_v10 = vpack.c.bf16 %v22_v8, %v21_v7  ;;  %v438_v12 = vpack.c.bf16 %v24_v11, %v23_v9  ;;  %v25_v13 = vld [vmem:[%s624_s1 + $0x40] sm:$0xff]  ;;  %v26_v14 = vld [vmem:[%s624_s1 + $0x48] sm:$0xff] }
   0x5   :  { %429 = vmatpush3.bf16.msra.mxu0 %v426_v3 }
   0x6   :  { %8 = vsyncpa [#allocation3], 0  ;;  %431 = vmatprep.subr.bf16.mxu0 %v430_v6  ;;  %435 = vmatprep.subr.bf16.mxu1 %v434_v10  ;;  %v442_v15 = vpack.c.bf16 %v26_v14, %v25_v13  ;;  %v16_v16 = vld [vmem:[%s623_s0 + $0x8] sm:$0xff]  ;;  %v27_v17 = vld [vmem:[%s624_s1 + $0x50] sm:$0xff]  ;;  %vm132_vm1 = vcmask 523264   ;;  %vm301_vm2 = vcmask 130048  }
   0x7   :  { %437 = vmatpush3.bf16.msra.mxu1 %v434_v10  ;;  %v28_v18 = vld [vmem:[%s624_s1 + $0x58] sm:$0xff]  ;;  %v31_v20 = vld [vmem:[%s625_s2] sm:$0xff]  ;;  %v32_v21 = vld [vmem:[%s625_s2 + $0x8] sm:$0xff] }
   0x8   :  { %439 = vmatprep.subr.bf16.mxu1 %v438_v12  ;;  %v446_v19 = vpack.c.bf16 %v28_v18, %v27_v17  ;;  %v33_v22 = vld [vmem:[%s625_s2 + $0x10] sm:$0xff]  ;;  %v450_v23 = vpack.c.bf16 %v32_v21, %v31_v20  ;;  %v34_v24 = vld [vmem:[%s625_s2 + $0x18] sm:$0xff]  ;;  %v35_v26 = vld [vmem:[%s625_s2 + $0x20] sm:$0xff] }
   0x9   :  { %433 = vmatpush3.bf16.msra.mxu0 %v430_v6  ;;  %v454_v25 = vpack.c.bf16 %v34_v24, %v33_v22  ;;  %v36_v27 = vld [vmem:[%s625_s2 + $0x28] sm:$0xff]  ;;  %v342_v29 = vld [vmem:[%s624_s1 + $0x60] ss:$0 sm:$0xff]  ;;  %v37_v36 = vld [vmem:[%s625_s2 + $0x30] sm:$0xff] }
   0xa   :  { %451 = vmatprep.subr.bf16.mxu0 %v450_v23  ;;  %v458_v28 = vpack.c.bf16 %v36_v27, %v35_v26  ;;  %v38_v37 = vld [vmem:[%s625_s2 + $0x38] sm:$0xff]  ;;  %v345_v39 = vld [vmem:[%s624_s1 + $0x61] ss:$0 sm:$0xff]  ;;  %v348_v46 = vld [vmem:[%s625_s2 + $0x40] ss:$0 sm:$0xff]  ;;  %s501_s1 = smov [#allocation2]  }
   0xb   :  { %441 = vmatpush3.bf16.msra.mxu1 %v438_v12  ;;  %v462_v38 = vpack.c.bf16 %v38_v37, %v37_v36  ;;  %s331_s2 = sshll.u32 %s501_s1, 4  ;;  %s332_s2 = int_to_ptr.vmem [resolvable:$true] %s331_s2 }
   0xc   :  { %386 = vmatmul.mubr.msk.f32.vlgmr.msra.gmra.mrb[0].mxu0 %vm44_vm0, %v16_v16  ;;  %443 = vmatprep.subr.bf16.mxu1 %v442_v15  ;;  %s477_s7 = scalar_lea.vmem %s332_s2, 256  ;;  %p482_p1 = scmp.lt.s32.totalorder %s332_s2, %s332_s2 }
   0xd   :  { %453 = vmatpush3.bf16.msra.mxu0 %v450_v23  ;;  %p478_p0 = scmp.ne.s32.totalorder %s332_s2, %s477_s7  ;;  %p483_p2 = scmp.lt.s32.totalorder %s477_s7, %s477_s7 }
   0xe   :  { %455 = vmatprep.subr.bf16.mxu0 %v454_v25 }
   0xf   :  { %445 = vmatpush3.bf16.msra.mxu1 %v442_v15  ;;  %p484_p3 = por %p483_p2, %p482_p1 }
  0x10   :  { %447 = vmatprep.subr.bf16.mxu1 %v446_v19 }
  0x11   :  { %457 = vmatpush3.bf16.msra.mxu0 %v454_v25  ;;  %p485_p4 = pnand %p484_p3, %p478_p0 }
  0x12   :  { %459 = vmatprep.subr.bf16.mxu0 %v458_v28 }
  0x13   :  { %449 = vmatpush3.bf16.msra.mxu1 %v446_v19 }
  0x15   :  { %461 = vmatpush3.bf16.msra.mxu0 %v458_v28 }
  0x16   :  { %463 = vmatprep.subr.bf16.mxu0 %v462_v38 }
  0x19   :  { %465 = vmatpush3.bf16.msra.mxu0 %v462_v38 }
  0xdf   :  { %v387_v30 = vpop.f32.mrb[0].mxu0 }
  0xe0   :  { %v123_v31 = vadd.f32 %v387_v30, %v342_v29  ;;  %v117_v32 = vpop.f32.mrb[1].mxu0 }
  0xe1   :  { %v118_v33 = vadd.f32 %v342_v29, %v117_v32 }
  0xe2   :  { %v127_v35 = vmax.f32 %v123_v31, 0.0 }
  0xe3   :  { %v126_v34 = vmax.f32 %v118_v33, 0.0 }
  0xe5   :  { %404 = vmatprep.mubr.msk.f32.mxu1 %vm132_vm1, %v126_v34 }
  0xe6   :  { %405 = vmatmul.mubr.msk.f32.vlgmr.msra.gmra.mrb[0].mxu1 %vm132_vm1, %v127_v35 }
 0x1b9   :  { %v406_v40 = vpop.f32.mrb[0].mxu1 }
 0x1ba   :  { %v211_v41 = vadd.f32 %v406_v40, %v345_v39  ;;  %v205_v42 = vpop.f32.mrb[1].mxu1 }
 0x1bb   :  { %v206_v43 = vadd.f32 %v345_v39, %v205_v42 }
 0x1bc   :  { %v215_v45 = vmax.f32 %v211_v41, 0.0 }
 0x1bd   :  { %v214_v44 = vmax.f32 %v206_v43, 0.0 }
 0x1bf   :  { %423 = vmatprep.mubr.msk.f32.mxu0 %vm132_vm1, %v214_v44 }
 0x1c0   :  { %424 = vmatmul.mubr.msk.f32.vlgmr.msra.gmra.mrb[2].mxu0 %vm132_vm1, %v215_v45 }
 0x293   :  { %v425_v47 = vpop.f32.mrb[2].mxu0 }
 0x294   :  { %v292_v48 = vpop.f32.mrb[3].mxu0  ;;  %v298_v50 = vadd.f32 %v425_v47, %v348_v46 }
 0x295   :  { %v293_v49 = vadd.f32 %v348_v46, %v292_v48 }
 0x296   :  { %v305_v52 = vsel %vm301_vm2, %v298_v50, -inf }
 0x297   :  { %v302_v51 = vsel %vm301_vm2, %v293_v49, -inf }
 0x298   :  { %303 = vmax.xlane.f32.xlu0 %v302_v51 }
 0x29c   :  { %306 = vmax.xlane.f32.xlu0 %v305_v52 }
 0x325   :  { %v304_v53 = vpop.xlane.xlu0 %303 }
 0x326   :  { %v308_v54 = vsub.f32 %v293_v49, %v304_v53 }
 0x328   :  { %v310_v55 = vmul.f32 1.442695, %v308_v54 }
 0x329   :  { %v307_v56 = vpop.xlane.xlu0 %306 }
 0x32a   :  { %469 = vpow2.f32 %v310_v55  ;;  %v309_v57 = vsub.f32 %v298_v50, %v307_v56 }
 0x32c   :  { %v312_v58 = vmul.f32 1.442695, %v309_v57 }
 0x32e   :  { %471 = vpow2.f32 %v312_v58 }
 0x334   :  { %v470_v59 = vpop.eup %469 }
 0x335   :  { %v314_v60 = vsel %vm301_vm2, %v470_v59, 0.0 }
 0x336   :  { %315 = vadd.xlane.f32.xlu1 %v314_v60 }
 0x338   :  { %v472_v61 = vpop.eup %471 }
 0x339   :  { %v317_v62 = vsel %vm301_vm2, %v472_v61, 0.0 }
 0x33a   :  { %318 = vadd.xlane.f32.xlu1 %v317_v62 }
 0x3c3   :  { %v316_v63 = vpop.xlane.xlu1 %315 }
 0x3c4   :  { %473 = vrcp.f32 %v316_v63 }
 0x3c7   :  { %v319_v0 = vpop.xlane.xlu1 %318 }
 0x3c8   :  { %475 = vrcp.f32 %v319_v0 }
 0x3ce   :  { %v474_v1 = vpop.eup %473 }
 0x3cf   :  { %v321_v2 = vmul.f32 %v474_v1, %v470_v59 }
 0x3d1   :  { %324 = vst.msk [vmem:[#allocation2] sm:$0xff] %vm301_vm2, %v321_v2 }
 0x3d2   :  { %v476_v3 = vpop.eup %475 }
 0x3d3   :  { %v323_v4 = vmul.f32 %v476_v3, %v472_v61 }
 0x3d5   :  { %325 = vst.msk [vmem:[#allocation2 + $0x8] sm:$0xff] %vm301_vm2, %v323_v4 }
 0x3d6   :  { %488 = shalt.err (!%p485_p4)
}
 0x3d7   :  { %s489_s10 = scalar_lea.hbm %s626_s3, 256 }
 0x3d8   :  { %p490_p5 = scmp.ne.s32.totalorder %s626_s3, %s489_s10  ;;  %p493_p6 = scmp.lt.u32.totalorder %s489_s10, %s626_s3 }
 0x3da   :  { %p495_p7 = pnand %p493_p6, %p490_p5 }
 0x3dc   :  { %498 = shalt.err (!%p495_p7)
}
 0x3dd   :  { %s502_s0 = smov 128   ;;  %s503_s15 = smov 8  }
 0x3de   :  { %337 = dma.vmem_to_hbm [thread:$0]  %s332_s2, 256, %s626_s3, [#allocation3], %s502_s0, %s502_s0, %s503_s15  }
 0x3df   :  { %499 = dma.done.wait [#allocation3], 256  }
 0x3e0   :  { %500 = vsyncadd [#allocation3], 4294967040 }
 0x3e1   :  { %341 = vsyncpa [#allocation3], 1 }

</bundles_post_ra>
